<compile_context>
chip_gen: v7x
topology: tpu7x:2x2x1
jax: 0.10.0
libtpu: 0.0.40
codegen_flags: <defaults>
</compile_context>

<pallas_src>
import functools

import jax
import jax.numpy as jnp
import numpy as np
from jax.experimental import pallas as pl
from jax.experimental.pallas import tpu as pltpu


def _round_up(v, m):
    return ((v + m - 1) // m) * m


def _apply_activation(y, activation, negative_slope):
    if activation is None:
        return y
    if activation == "LeakyReLU":
        return jnp.where(y >= 0, y, negative_slope * y)
    if activation == "ReLU":
        return jnp.maximum(y, 0.0)
    if activation == "Sigmoid":
        return jax.nn.sigmoid(y)
    if activation in ("Tanh", "tanh"):
        return jnp.tanh(y)
    raise ValueError(f"unsupported activation: {activation!r}")


# ---------------------------------------------------------------------------
# Kernels
# ---------------------------------------------------------------------------

def _linear_kernel_single(*refs, activation, negative_slope, has_bias):
    """Single-pass kernel: the full (padded) K dimension is resident."""
    if has_bias:
        x_ref, w_ref, b_ref, o_ref = refs
    else:
        x_ref, w_ref, o_ref = refs
        b_ref = None
    y = jnp.dot(x_ref[...], w_ref[...], preferred_element_type=jnp.float32)
    if has_bias:
        y = y + b_ref[...]                       # (tm, tn) + (1, tn)
    y = _apply_activation(y, activation, negative_slope)
    o_ref[...] = y.astype(o_ref.dtype)


def _linear_kernel_kaxis(*refs, activation, negative_slope, has_bias,
                         use_scratch):
    """K-tiled kernel.  Accumulates directly into the resident f32 output
    block (use_scratch=False) or into a VMEM scratch (non-f32 outputs)."""
    if has_bias:
        x_ref, w_ref, b_ref = refs[:3]
        rest = refs[3:]
    else:
        x_ref, w_ref = refs[:2]
        b_ref = None
        rest = refs[2:]
    if use_scratch:
        o_ref, acc_ref = rest
    else:
        (o_ref,) = rest
        acc_ref = o_ref                          # f32 output doubles as acc

    k = pl.program_id(2)

    @pl.when(k == 0)
    def _():
        acc_ref[...] = jnp.zeros_like(acc_ref)

    acc_ref[...] += jnp.dot(x_ref[...], w_ref[...],
                            preferred_element_type=jnp.float32)

    @pl.when(k == pl.num_programs(2) - 1)
    def _():
        y = acc_ref[...]
        if has_bias:
            y = y + b_ref[...]
        y = _apply_activation(y, activation, negative_slope)
        o_ref[...] = y.astype(o_ref.dtype)


# ---------------------------------------------------------------------------
# Per-call apply (x changes; weight/bias already prepared)
# ---------------------------------------------------------------------------

def _apply_linear(x, wt, bp, *, plan):
    K, N = plan["K"], plan["N"]
    Kp, Np = plan["Kp"], plan["Np"]
    tn, tk = plan["tn"], plan["tk"]
    activation = plan["activation"]
    negative_slope = plan["negative_slope"]
    out_dtype = plan["out_dtype"]
    operand_dtype = plan["operand_dtype"]
    has_bias = plan["has_bias"]

    *lead, Kx = x.shape
    assert Kx == K, f"expected last dim {K}, got {Kx}"
    x2 = x.reshape(-1, K)
    M = x2.shape[0]

    # Row tiling; keep >=2 output tiles when possible so both v7x TensorCores
    # get work via the "parallel" grid axes.
    tm = min(plan["tm"], _round_up(M, 8))
    Mp = _round_up(M, tm)
    if (Mp // tm) * (Np // tn) < 2:
        m8 = _round_up(M, 8)
        if m8 >= 16:
            tm = _round_up((m8 + 1) // 2, 8)
            Mp = _round_up(M, tm)

    # Cast to bf16 operands, pad only when needed.
    if x2.dtype != np.dtype(operand_dtype):
        x2 = x2.astype(operand_dtype)
    if (Mp, Kp) != (M, K):
        x2 = jnp.pad(x2, ((0, Mp - M), (0, Kp - K)))

    gi, gj, gk = Mp // tm, Np // tn, Kp // tk

    if gk > 1:
        in_specs = [
            pl.BlockSpec((tm, tk), lambda i, j, k: (i, k)),   # x tile
            pl.BlockSpec((tk, tn), lambda i, j, k: (k, j)),   # W^T tile
        ]
        if has_bias:
            in_specs.append(pl.BlockSpec((1, tn), lambda i, j, k: (0, j)))
        out_spec = pl.BlockSpec((tm, tn), lambda i, j, k: (i, j))
        grid = (gi, gj, gk)
        dims = ("parallel", "parallel", "arbitrary")
        use_scratch = np.dtype(out_dtype) != np.dtype(jnp.float32)
        kernel = functools.partial(
            _linear_kernel_kaxis, activation=activation,
            negative_slope=negative_slope, has_bias=has_bias,
            use_scratch=use_scratch)
        scratch = (pltpu.VMEM((tm, tn), jnp.float32),) if use_scratch else ()
    else:
        in_specs = [
            pl.BlockSpec((tm, tk), lambda i, j: (i, 0)),
            pl.BlockSpec((tk, tn), lambda i, j: (0, j)),
        ]
        if has_bias:
            in_specs.append(pl.BlockSpec((1, tn), lambda i, j: (0, j)))
        out_spec = pl.BlockSpec((tm, tn), lambda i, j: (i, j))
        grid = (gi, gj)
        dims = ("parallel", "parallel")
        kernel = functools.partial(
            _linear_kernel_single, activation=activation,
            negative_slope=negative_slope, has_bias=has_bias)
        scratch = ()

    op_b = np.dtype(operand_dtype).itemsize
    out_b = np.dtype(out_dtype).itemsize
    footprint = (2 * (tm * tk + tk * tn) * op_b       # double-buffered inputs
                 + 2 * tm * tn * out_b                # double-buffered output
                 + (2 * tn * 4 if has_bias else 0)
                 + len(scratch) * tm * tn * 4)
    vmem_limit = int(min(max(2 * footprint, 32 * 1024 * 1024),
                         48 * 1024 * 1024))

    bytes_accessed = (Mp * Kp * op_b + Kp * Np * op_b
                      + (Np * 4 if has_bias else 0) + Mp * Np * out_b)
    transc = Mp * Np if activation in ("Sigmoid", "Tanh", "tanh") else 0
    cost = pl.CostEstimate(flops=2 * Mp * Np * Kp, transcendentals=transc,
                           bytes_accessed=bytes_accessed)

    inputs = (x2, wt, bp) if has_bias else (x2, wt)
    out = pl.pallas_call(
        kernel,
        out_shape=jax.ShapeDtypeStruct((Mp, Np), out_dtype),
        grid_spec=pltpu.PrefetchScalarGridSpec(
            num_scalar_prefetch=0,
            grid=grid,
            in_specs=in_specs,
            out_specs=out_spec,
            scratch_shapes=scratch,
        ),
        compiler_params=pltpu.CompilerParams(
            dimension_semantics=dims,
            vmem_limit_bytes=vmem_limit,
        ),
        cost_estimate=cost,
    )(*inputs)

    return out[:M, :N].reshape(*lead, N)


# ---------------------------------------------------------------------------
# Factory: one-time weight prep + reusable apply closure
# ---------------------------------------------------------------------------

def make_linear_layer(weight, bias=None, *, activation="LeakyReLU",
                      negative_slope=0.01, out_dtype=jnp.float32,
                      operand_dtype=jnp.bfloat16, tm=256, tn=256, tk=None,
                      k_resident_max=4096, jit=True):
    """Prepare `y = activation(x @ weight.T + bias)` as a reusable closure.

    weight: (N, K) torch nn.Linear layout; bias: (N,) or None.
    The weight is transposed, padded and cast to bf16 exactly once here.
    """
    weight = jnp.asarray(weight)
    N, K = weight.shape

    tn = min(tn, _round_up(N, 128))
    Np = _round_up(N, tn)
    Kp_min = _round_up(K, 128)
    if tk is None:
        # K-resident when it fits comfortably in VMEM -> no reduction axis.
        tk = Kp_min if Kp_min <= k_resident_max else 512
    tk = _round_up(min(tk, Kp_min), 128)
    Kp = _round_up(K, tk)

    # One-time weight prep (hoisted out of the per-call path).
    wt = weight.astype(jnp.float32).T                 # (K, N), lane-dense N
    if (Kp, Np) != (K, N):
        wt = jnp.pad(wt, ((0, Kp - K), (0, Np - N)))
    wt = wt.astype(operand_dtype)

    has_bias = bias is not None
    bp = None
    if has_bias:
        bp = jnp.asarray(bias, jnp.float32).reshape(1, N)
        if Np != N:
            bp = jnp.pad(bp, ((0, 0), (0, Np - N)))

    plan = dict(K=K, N=N, Kp=Kp, Np=Np, tn=tn, tk=tk, tm=tm,
                activation=activation, negative_slope=negative_slope,
                out_dtype=out_dtype, operand_dtype=operand_dtype,
                has_bias=has_bias)

    fn = functools.partial(_apply_linear, plan=plan)
    if jit:
        fn = jax.jit(fn)

    def apply(x):
        return fn(x, wt, bp)

    return apply


def linear_layer(x, weight, bias=None, **kwargs):
    """One-shot convenience wrapper (prefer make_linear_layer for reuse)."""
    return make_linear_layer(weight, bias, jit=False, **kwargs)(x)


def linear_layer_ref(x, weight, bias=None, activation="LeakyReLU",
                     negative_slope=0.01):
    """Pure-JAX reference mirroring LinearLayer.forward (norm=None)."""
    y = jnp.einsum("...k,nk->...n", x, weight)
    if bias is not None:
        y = y + bias
    return _apply_activation(y, activation, negative_slope)


if __name__ == "__main__":
    key = jax.random.PRNGKey(0)
    k1, k2, k3, k4, k5, k6, k7, k8 = jax.random.split(key, 8)

    # 1) Default LinearLayer config: LeakyReLU + bias, small shapes.
    B, S, CIN, COUT = 2, 8, 32, 64
    x = jax.random.normal(k1, (B, S, CIN), jnp.float32)
    w = jax.random.normal(k2, (COUT, CIN), jnp.float32) / np.sqrt(CIN)
    b = 0.1 * jax.random.normal(k3, (COUT,), jnp.float32)
    layer = make_linear_layer(w, b)                   # weight prepped once
    out = jax.block_until_ready(layer(x))
    ref = linear_layer_ref(x, w, b)
    np.testing.assert_allclose(np.asarray(out), np.asarray(ref),
                               rtol=2e-2, atol=2e-2)

    # 2) Multi-tile grid with a K reduction axis (tk forced below Kp) to
    #    exercise the accumulate-into-o_ref path and pl.when init/finalize.
    M2, K2, N2 = 384, 256, 256
    x2 = jax.random.normal(k4, (M2, K2), jnp.float32)
    w2 = jax.random.normal(k5, (N2, K2), jnp.float32) / np.sqrt(K2)
    b2 = 0.1 * jax.random.normal(k6, (N2,), jnp.float32)
    out2 = jax.block_until_ready(make_linear_layer(w2, b2, tk=128)(x2))
    ref2 = linear_layer_ref(x2, w2, b2)
    np.testing.assert_allclose(np.asarray(out2), np.asarray(ref2),
                               rtol=2e-2, atol=2e-2)

    # 3) bias=False + Sigmoid (no-bias kernel path + EUP activation).
    K3, N3 = 32, 48
    x3 = jax.random.normal(k7, (4, 8, K3), jnp.float32)
    w3 = jax.random.normal(k8, (N3, K3), jnp.float32) / np.sqrt(K3)
    out3 = jax.block_until_ready(
        make_linear_layer(w3, None, activation="Sigmoid")(x3))
    ref3 = linear_layer_ref(x3, w3, None, activation="Sigmoid")
    np.testing.assert_allclose(np.asarray(out3), np.asarray(ref3),
                               rtol=2e-2, atol=2e-2)

    print("KERNEL_OK")
</pallas_src>

<mosaic_0001>
module attributes {stable_mosaic.version = 11 : i64} {
  func.func @_linear_kernel_single(%arg0: i32, %arg1: i32, %arg2: memref<8x128xbf16, #tpu.memory_space<vmem>>, %arg3: memref<128x128xbf16, #tpu.memory_space<vmem>>, %arg4: memref<1x128xf32, #tpu.memory_space<vmem>>, %arg5: memref<8x128xf32, #tpu.memory_space<vmem>>) attributes {dimension_semantics = [#tpu.dimension_semantics<parallel>, #tpu.dimension_semantics<parallel>], iteration_bounds = array<i64: 2, 1>, scalar_prefetch = 0 : i64, scratch_operands = 0 : i64, tpu.core_type = #tpu.core_type<tc>, window_params = [{transform_indices = @transform_0, window_bounds = array<i64: 8, 128>}, {transform_indices = @transform_1, window_bounds = array<i64: 128, 128>}, {transform_indices = @transform_2, window_bounds = array<i64: 1, 128>}, {transform_indices = @transform_3, window_bounds = array<i64: 8, 128>}]} {
    %c0 = arith.constant 0 : index
    %c0_0 = arith.constant 0 : index
    %0 = vector.load %arg2[%c0, %c0_0] : memref<8x128xbf16, #tpu.memory_space<vmem>>, vector<8x128xbf16>
    %c0_1 = arith.constant 0 : index
    %c0_2 = arith.constant 0 : index
    %1 = vector.load %arg3[%c0_1, %c0_2] : memref<128x128xbf16, #tpu.memory_space<vmem>>, vector<128x128xbf16>
    %cst = arith.constant dense<0.000000e+00> : vector<8x128xf32>
    %2 = tpu.matmul %0, %1, %cst {dimension_numbers = #tpu.dot_dimension_numbers<[1], [0], [0], [1], [0, 0, 1, 1], [], []>} : vector<8x128xbf16>, vector<128x128xbf16>, vector<8x128xf32> -> vector<8x128xf32>
    %c0_3 = arith.constant 0 : index
    %c0_4 = arith.constant 0 : index
    %3 = vector.load %arg4[%c0_3, %c0_4] : memref<1x128xf32, #tpu.memory_space<vmem>>, vector<1x128xf32>
    %4 = vector.broadcast %3 : vector<1x128xf32> to vector<8x128xf32>
    %5 = arith.addf %2, %4 : vector<8x128xf32>
    %cst_5 = arith.constant 0.000000e+00 : f32
    %6 = vector.broadcast %cst_5 : f32 to vector<8x128xf32>
    %7 = arith.cmpf oge, %5, %6 : vector<8x128xf32>
    %cst_6 = arith.constant 0.00999999977 : f32
    %8 = vector.broadcast %cst_6 : f32 to vector<8x128xf32>
    %9 = arith.mulf %8, %5 : vector<8x128xf32>
    %10 = arith.select %7, %5, %9 : vector<8x128xi1>, vector<8x128xf32>
    %c0_7 = arith.constant 0 : index
    %c0_8 = arith.constant 0 : index
    %11 = vector.load %arg5[%c0_7, %c0_8] : memref<8x128xf32, #tpu.memory_space<vmem>>, vector<8x128xf32>
    tpu.vector_store %arg5[%c0_7, %c0_8], %10 {strides = array<i32>} : memref<8x128xf32, #tpu.memory_space<vmem>>, vector<8x128xf32>,
    return
  }
  func.func @transform_0(%arg0: i32, %arg1: i32) -> (i32, i32) {
    %c0_i32 = arith.constant 0 : i32
    %c0_i32_0 = arith.constant 0 : i32
    return %arg0, %c0_i32 : i32, i32
  }
  func.func @transform_1(%arg0: i32, %arg1: i32) -> (i32, i32) {
    %c0_i32 = arith.constant 0 : i32
    %c0_i32_0 = arith.constant 0 : i32
    return %c0_i32, %arg1 : i32, i32
  }
  func.func @transform_2(%arg0: i32, %arg1: i32) -> (i32, i32) {
    %c0_i32 = arith.constant 0 : i32
    %c0_i32_0 = arith.constant 0 : i32
    return %c0_i32, %arg1 : i32, i32
  }
  func.func @transform_3(%arg0: i32, %arg1: i32) -> (i32, i32) {
    %c0_i32 = arith.constant 0 : i32
    return %arg0, %arg1 : i32, i32
  }
}

</mosaic_0001>

<bundles_post_ra>
// kernel: _apply_linear.1
= control target key start
LH: loop header
LB: loop body
LE: loop exit
PB: predicated region body
PF: predicated region fallthrough
CT: control target
= control target key end

     0   :  { %8 = vsyncpa [#allocation3], 0  ;;  %s615_s12 = smov 0   ;;  %s617_s13 = smov 0   ;;  %s694_s0 = inlined_call_operand.vmem [shape: bf16[16,128], index: 0, kind: input, shape index: {}]   ;;  %s695_s1 = inlined_call_operand.hbm [shape: bf16[128,128], index: 1, kind: input, shape index: {}]   ;;  %s696_s2 = inlined_call_operand.vmem [shape: f32[1,128], index: 2, kind: input, shape index: {}]   ;;  %s697_s3 = inlined_call_operand.vmem [shape: f32[16,128], index: 3, kind: output, shape index: {}]  }
   0x1   :  { %s619_s14 = smov 0  }
   0x2 LB: > { %s437_s15 = sadd.s32 4294967295, %s588_s14   ;;  %s26_s16 = sadd.s32 1, %s584_s13  ;;  %s588_s14 = sphi %s619_s14, %s14_s14   ;;  %s584_s13 = sphi %s617_s13, %s707_s13   ;;  %s580_s12 = sphi %s615_s12, %s706_s12  }
   0x3   : > { %p28_p0 = scmp.ge.s32.totalorder %s26_s16, 2  ;;  %p439_p1 = scmp.ge.s32.totalorder %s588_s14, 1 }
   0x4   : > { %p137_p2 = scmp.lt.s32.totalorder %s588_s14, 3  ;;  %p640_p4 = scmp.eq.s32.totalorder %s437_s15, 0 }
   0x5   : > { %s709_s16 = smov (%p28_p0, %s26_s16), 0  ;;  %s590_s19 = smov [#allocation2]  }
   0x6   : > { %p636_p3 = pnand %p439_p1, %p137_p2  ;;  %s151_s20 = sshll.u32 %s590_s19, 4  ;;  %s152_s20 = int_to_ptr.vmem [resolvable:$true] %s151_s20 }
   0x7   : > { %s702_s18 = scalar_select %p640_p4, 1, 0 }
   0x8   : > { %s701_s17 = scalar_select %p636_p3, 1, 0 }
   0x9   : > { %p491_p5 = pneg %p636_p3  ;;  %s534_s24 = scalar_lea.hbm %s695_s1, 1024 }
   0xa   : > { %p535_p7 = scmp.ne.s32.totalorder %s695_s1, %s534_s24  ;;  %p541_p11 = scmp.lt.u32.totalorder %s534_s24, %s695_s1 }
   0xb   : > { %p648_p6 = pnand %p640_p4, %p491_p5 }
   0xd   : > { %p536_p8 = pneg %p648_p6 }
   0xf   : > { %p537_p9 = pnand %p536_p8, %p535_p7 }
  0x11   : > { %p538_p10 = pneg %p537_p9 }
  0x13   : > { %p543_p12 = pnand %p541_p11, %p538_p10 }
  0x15   : > { %546 = shalt.err (!%p543_p12)
}
  0x16   : > { %s547_s29 = scalar_lea.vmem %s152_s20, 1024  ;;  %p555_p2 = scmp.lt.s32.totalorder %s152_s20, %s152_s20 }
  0x17   : > { %p548_p13 = scmp.ne.s32.totalorder %s152_s20, %s547_s29  ;;  %p556_p5 = scmp.lt.s32.totalorder %s547_s29, %s547_s29 }
  0x19   : > { %p550_p0 = pnand %p548_p13, %p536_p8  ;;  %p557_p4 = por %p556_p5, %p555_p2 }
  0x1b   : > { %p551_p1 = pneg %p550_p0 }
  0x1d   : > { %p558_p3 = pnand %p557_p4, %p551_p1 }
  0x1f   : > { %561 = shalt.err (!%p558_p3)
}
  0x20   : > { %s591_s30 = smov 64   ;;  %s592_s4 = smov 4  }
  0x21   : > { %494 = dma.hbm_to_vmem [thread:$0]  (!%p648_p6), %s695_s1, 1024, %s152_s20, [#allocation3], %s591_s30, %s591_s30, %s592_s4  }
  0x22   : > { %p704_p7 = scmp.ne.s32.totalorder %s701_s17, 0 }
  0x23   : > { %p705_p9 = scmp.ne.s32.totalorder (!%p704_p7), %s702_s18, 0 }
  0x24   : > { %180 = sbr.rel (%p704_p7) target bundleno = 295 (0x127), region = 32 }
  0x2b   : > { %575 = dma.done.wait (%p705_p9), [#allocation3], 1024  }
  0x2c   : > { %577 = vsyncadd (%p705_p9), [#allocation3], 4294966272  ;;  %v593_v0 = vmov 0.0   ;;  %vm594_vm0 = vmmov 0   ;;  %v526_v1 = vld [vmem:[#allocation2] sm:$0xff]   ;;  %v527_v2 = vld [vmem:[#allocation2 + $0x8] sm:$0xff]  }
  0x2d   : > { %467 = vmatprep.subr.bf16.mxu0 %v593_v0  ;;  %483 = vmatprep.mubr.msk.bf16.mxu0 %vm594_vm0, %v593_v0  ;;  %v528_v3 = vld [vmem:[#allocation2 + $0x10] sm:$0xff]   ;;  %v529_v4 = vld [vmem:[#allocation2 + $0x18] sm:$0xff]   ;;  %v530_v5 = vld [vmem:[#allocation2 + $0x20] sm:$0xff]   ;;  %p208_p3 = scmp.lt.s32.totalorder %s580_s12, 1 }
  0x2e   : > { %468 = vmatpush3.bf16.msra.mxu0 %v526_v1  ;;  %v531_v6 = vld [vmem:[#allocation2 + $0x28] sm:$0xff]   ;;  %v532_v7 = vld [vmem:[#allocation2 + $0x30] sm:$0xff]   ;;  %v533_v8 = vld [vmem:[#allocation2 + $0x38] sm:$0xff]  }
  0x2f   : > { %469 = vmatprep.subr.bf16.mxu0 %v593_v0  ;;  %s711_s12 = smov (!%p208_p3, %s580_s12), 1  ;;  %v447_v10 = vld [vmem:[%s696_s2] ss:$0 sm:$0xff] }
  0x30   : > { %s445_s7 = sshll.u32 %s711_s12, 2  ;;  %s446_s17 = sshll.u32 %s711_s12, 3 }
  0x31   : > { %s211_s10 = scalar_lea.vmem %s694_s0, %s445_s7  ;;  %s221_s20 = scalar_lea.vmem %s697_s3, %s446_s17 }
  0x32   : > { %470 = vmatpush3.bf16.msra.mxu0 %v527_v2  ;;  %v223_v9 = vld [vmem:[%s211_s10] sm:$0xf] }
  0x33   : > { %471 = vmatprep.subr.bf16.mxu0 %v593_v0 }
  0x36   : > { %472 = vmatpush3.bf16.msra.mxu0 %v528_v3 }
  0x37   : > { %473 = vmatprep.subr.bf16.mxu0 %v593_v0 }
  0x3a   : > { %474 = vmatpush3.bf16.msra.mxu0 %v529_v4 }
  0x3b   : > { %475 = vmatprep.subr.bf16.mxu0 %v593_v0 }
  0x3e   : > { %476 = vmatpush3.bf16.msra.mxu0 %v530_v5 }
  0x3f   : > { %477 = vmatprep.subr.bf16.mxu0 %v593_v0 }
  0x42   : > { %478 = vmatpush3.bf16.msra.mxu0 %v531_v6 }
  0x43   : > { %479 = vmatprep.subr.bf16.mxu0 %v593_v0 }
  0x46   : > { %480 = vmatpush3.bf16.msra.mxu0 %v532_v7 }
  0x47   : > { %481 = vmatprep.subr.bf16.mxu0 %v593_v0 }
  0x4a   : > { %482 = vmatpush3.bf16.msra.mxu0 %v533_v8 }
  0x4d   : > { %484 = vmatmul.mubr.bf16.vlgmr.msra.gmra.mrb[0].mxu0 %v223_v9 }
 0x120   : > { %v329_v11 = vpop.f32.mrb[0].mxu0 }
 0x121   : > { %v330_v12 = vadd.f32 %v447_v10, %v329_v11  ;;  %v485_v13 = vpop.f32.mrb[1].mxu0 }
 0x122   : > { %v332_v14 = vpop.f32.mrb[2].mxu0 }
 0x123   : > { %vm335_vm1 = vcmp.ge.f32.partialorder %v330_v12, 0.0  ;;  %v336_v15 = vmul.f32 0.01, %v330_v12  ;;  %v486_v16 = vpop.f32.mrb[3].mxu0 }
 0x125   : > { %v337_v17 = vsel %vm335_vm1, %v330_v12, %v336_v15 }
 0x126   : > { %338 = vst [vmem:[%s221_s20] sm:$0xff] %v337_v17 }
 0x127 PF: > { %s14_s14 = sadd.s32 1, %s588_s14   ;;  %s706_s12 = smov %s584_s13 }
 0x128   : > { %p11_p4 = scmp.ge.s32.totalorder %s14_s14, 4   ;;  %s707_s13 = smov %s709_s16 }
 0x12a   :  { %13 = sbr.rel (!%p11_p4) target bundleno = 2 (0x2), region = 71 }
 0x131   :  { %364 = vsyncpa [#allocation3], 1 }
 0x132   :  { %366 = vsyncpa [#allocation3 + $0x1], 1 }

</bundles_post_ra>
